<compile_context>
chip_gen: v6e
topology: v6e:2x2x1
jax: 0.10.0
libtpu: 0.0.40
codegen_flags: <defaults>
</compile_context>

<pallas_src>
import math
import functools

import jax
import jax.numpy as jnp
from jax.experimental import pallas as pl
from jax.experimental.pallas import tpu as pltpu


# -----------------------------------------------------------------------------
# Kernel
# -----------------------------------------------------------------------------
def _mhca_kernel(wkq_ref, wvo_ref, bc_ref, x_ref, out_ref,
                 m_scr, l_scr, acc_scr, *, heads, approx_reciprocal):
    """Grid = (batch blocks, sequence blocks).  The sequence axis is a
    reduction handled with an online softmax; the output block is revisited
    across it and only written on the final sequence step.

    wkq_ref : (D, H)      folded query-keys, pre-transposed (x stays natural)
    wvo_ref : (H, D, D)   folded value+output projections (Wv_h @ Wo_h)
    bc_ref  : (1, D)      constant bias (sum_h bv_h @ Wo_h + bo), f32
    x_ref   : (B, tS, D)  keys == values tile
    out_ref : (B, D)      pooled outputs (lane-dense 2-D block)
    m_scr   : (B, H, 1)   running max              (f32)
    l_scr   : (B, H, 1)   running softmax denom    (f32)
    acc_scr : (B, H, D)   running weighted x sum   (f32)
    """
    si = pl.program_id(1)
    ns = pl.num_programs(1)

    @pl.when(si == 0)
    def _init():
        m_scr[...] = jnp.full(m_scr.shape, -jnp.inf, jnp.float32)
        l_scr[...] = jnp.zeros(l_scr.shape, jnp.float32)
        acc_scr[...] = jnp.zeros(acc_scr.shape, jnp.float32)

    B, tS, D = x_ref.shape
    x = x_ref[...]                                               # (B, tS, D)

    # ---- QK^T: x used in its natural (rows on sublanes, D on lanes) layout;
    # only the tiny (tS, H) score tile is transposed afterwards. ----
    s2 = jnp.dot(x.reshape(B * tS, D), wkq_ref[...],
                 preferred_element_type=jnp.float32)             # (B*tS, H)
    s = jnp.swapaxes(s2.reshape(B, tS, heads), 1, 2)             # (B, H, tS) f32

    # ---- online softmax over the sequence axis (f32 statistics) ----
    m_prev = m_scr[...]
    m_new = jnp.maximum(m_prev, jnp.max(s, axis=-1, keepdims=True))
    alpha = jnp.exp(m_prev - m_new)                              # (B, H, 1)
    p = jnp.exp(s - m_new)                                       # (B, H, tS)
    l_scr[...] = alpha * l_scr[...] + jnp.sum(p, axis=-1, keepdims=True)
    acc_scr[...] = alpha * acc_scr[...] + jnp.einsum(
        "bhs,bsd->bhd", p.astype(x.dtype), x,
        preferred_element_type=jnp.float32)                      # (B, H, D) f32
    m_scr[...] = m_new

    # ---- finalize: normalize + folded value/output projection ----
    @pl.when(si == ns - 1)
    def _finalize():
        if approx_reciprocal:
            pooled = acc_scr[...] * pl.reciprocal(l_scr[...], approx=True)
        else:
            pooled = acc_scr[...] / l_scr[...]                   # (B, H, D) f32
        acc = bc_ref[...]                                        # (1, D) f32
        for h in range(heads):                                   # static unroll
            acc = acc + jnp.dot(pooled[:, h, :].astype(wvo_ref.dtype),
                                wvo_ref[h],
                                preferred_element_type=jnp.float32)
        out_ref[...] = acc.astype(out_ref.dtype)                 # (B, D)


# -----------------------------------------------------------------------------
# Parameter folding (once, outside the kernel)
# -----------------------------------------------------------------------------
def _fold_params(params, *, heads, compute_dtype=None):
    D, proj = params["wq"].shape
    dh = proj // heads
    inv_scale = 1.0 / math.sqrt(dh)

    # Batch-invariant query projection, hoisted out of the kernel.
    q = (params["u"] @ params["wq"] + params["bq"]).reshape(heads, dh)  # (H, dh)

    # Fold q (and 1/sqrt(d_head)) into the key projection; bk only shifts each
    # head's scores by a constant -> drops out of the softmax.  Pre-transposed
    # to (D, H) so the in-kernel QK matmul keeps x in its natural orientation.
    wk = params["wk"].reshape(D, heads, dh)
    wkq_t = jnp.einsum("dhe,he->dh", wk, q) * inv_scale                 # (D, H)

    # Fold value and output projections: Wvo_h = Wv_h @ Wo_h.
    wv = params["wv"].reshape(D, heads, dh)
    wo = params["wo"].reshape(heads, dh, D)
    wvo = jnp.einsum("dhe,heo->hdo", wv, wo)                            # (H, D, D)
    # Attention weights sum to 1 -> value bias becomes a constant offset.
    b_const = (jnp.einsum("he,heo->o", params["bv"].reshape(heads, dh), wo)
               .reshape(1, D) + params["bo"]).astype(jnp.float32)       # (1, D)

    if compute_dtype is not None:
        wkq_t = wkq_t.astype(compute_dtype)
        wvo = wvo.astype(compute_dtype)
    return wkq_t, wvo, b_const


# -----------------------------------------------------------------------------
# Generation-aware tile sizing
# -----------------------------------------------------------------------------
def _vmem_capacity_bytes():
    try:
        info = pltpu.get_tpu_info()
        for name in ("vmem_capacity_bytes", "vmem_bytes"):
            cap = getattr(info, name, None)
            if cap:
                return int(cap)
    except Exception:
        pass
    return 128 << 20


def _row_bytes(block_s, D, heads, x_elt, out_elt):
    """Approximate VMEM bytes needed per batch row for one sequence tile."""
    h_pad = -(-heads // 8) * 8
    return (2 * block_s * D * x_elt          # x tile (double-buffered)
            + block_s * 128 * 4              # (tS, H) f32 scores (lane-padded)
            + 2 * h_pad * block_s * 4        # transposed scores + softmax numerator
            + 2 * heads * D * 4              # pooled delta + running accumulator
            + 2 * D * (4 + out_elt))         # epilogue accumulator + out tile


def _choose_tiles(bs, S, D, heads, x_elt, out_elt, stream_budget):
    min_bb = bs if bs < 8 else 8

    def fits(bb, ss):
        return bb * _row_bytes(ss, D, heads, x_elt, out_elt) <= stream_budget

    # Sequence tile: whole sequence if it fits; otherwise the largest
    # multiple-of-8 divisor of S that fits (ragged S tiles would corrupt the
    # softmax reduction, so only exact divisors are used).
    if fits(min_bb, S) or S % 8 != 0 or S <= 8:
        block_s = S   # TODO(synk): ragged-S tiling would need in-kernel masking
    else:
        block_s = 8
        for t in range(S - 8, 8, -8):
            if S % t == 0 and fits(min_bb, t):
                block_s = t
                break

    # Batch tile: biggest multiple of 8 that fits the remaining byte budget,
    # capped so the parallel batch axis keeps >= 2 grid steps (both v7x
    # TensorCores busy) whenever the batch is large enough to split.
    if bs <= 8:
        block_b = bs
    else:
        per_row = _row_bytes(block_s, D, heads, x_elt, out_elt)
        block_b = int(stream_budget // max(per_row, 1)) // 8 * 8
        block_b = max(8, min(block_b, (bs // 8) * 8))
        if bs >= 16:
            block_b = min(block_b, max(8, (bs // 2) // 8 * 8))
    return block_b, block_s


# -----------------------------------------------------------------------------
# Wrapper
# -----------------------------------------------------------------------------
def multihead_contextual_attention(x, params, *, heads,
                                   block_b=None, block_s=None,
                                   compute_dtype=jnp.bfloat16,
                                   approx_reciprocal=True):
    """x: (bs, S, d_model) -> (bs, 1, d_model).

    compute_dtype=None keeps the x stream / folded weights in f32 (exact-parity
    path); the default bf16 path keeps all softmax statistics and matmul
    accumulation in f32.
    """
    bs, S, D = x.shape
    out_dtype = x.dtype

    wkq_t, wvo, b_const = _fold_params(params, heads=heads,
                                       compute_dtype=compute_dtype)
    if compute_dtype is not None:
        x = x.astype(compute_dtype)
    x_elt = jnp.dtype(x.dtype).itemsize
    out_elt = jnp.dtype(out_dtype).itemsize

    # ---- generation-aware VMEM budgeting ----
    vmem_cap = _vmem_capacity_bytes()
    # v7x-class parts have 64 MiB physical VMEM per TensorCore -> leave the
    # compiler headroom (<= ~52 MiB).  v5e/v6e have 128 MiB -> allow ~100 MiB.
    vmem_ceiling = (52 << 20) if vmem_cap <= (64 << 20) else (100 << 20)

    w_bytes = sum(int(a.size) * jnp.dtype(a.dtype).itemsize
                  for a in (wkq_t, wvo, b_const))
    # The folded weights' block index never changes, so they are only DMA'd
    # once, but the default pipeline still allocates a second buffer; the
    # budget reserves it.  TODO(synk): single-buffer them (pl.Buffered(1))
    # once pipeline_mode on the top-level pallas_call pipeline is guaranteed.
    resident = 2 * w_bytes
    headroom = 8 << 20
    stream_budget = max(vmem_ceiling - resident - headroom, 4 << 20)

    bb, ss = _choose_tiles(bs, S, D, heads, x_elt, out_elt, stream_budget)
    if block_b is not None:
        bb = min(block_b, bs)
    if block_s is not None:
        ss = min(block_s, S)
    # Safety: sequence tiles must divide S exactly (reduction axis); batch
    # tiles must be 8-aligned or cover the full batch.
    if ss != S and S % ss != 0:
        ss = S
    if bb != bs and bb % 8 != 0:
        bb = bs if bs <= 8 else max(8, (bb // 8) * 8)

    grid = (pl.cdiv(bs, bb), pl.cdiv(S, ss))

    need = resident + bb * _row_bytes(ss, D, heads, x_elt, out_elt) + headroom
    vmem_limit = int(min(vmem_ceiling, max(need, 32 << 20)))

    kernel = functools.partial(_mhca_kernel, heads=heads,
                               approx_reciprocal=approx_reciprocal)

    out2d = pl.pallas_call(
        kernel,
        out_shape=jax.ShapeDtypeStruct((bs, D), out_dtype),
        grid_spec=pltpu.PrefetchScalarGridSpec(
            num_scalar_prefetch=0,
            grid=grid,
            in_specs=[
                pl.BlockSpec(wkq_t.shape, lambda b, s: (0, 0)),        # (D, H)
                pl.BlockSpec(wvo.shape, lambda b, s: (0, 0, 0)),       # (H, D, D)
                pl.BlockSpec(b_const.shape, lambda b, s: (0, 0)),      # (1, D)
                pl.BlockSpec((bb, ss, D), lambda b, s: (b, s, 0)),     # x
            ],
            out_specs=pl.BlockSpec((bb, D), lambda b, s: (b, 0)),
            scratch_shapes=[
                pltpu.VMEM((bb, heads, 1), jnp.float32),   # running max
                pltpu.VMEM((bb, heads, 1), jnp.float32),   # running denom
                pltpu.VMEM((bb, heads, D), jnp.float32),   # running weighted sum
            ],
        ),
        compiler_params=pltpu.CompilerParams(
            dimension_semantics=("parallel", "arbitrary"),
            vmem_limit_bytes=vmem_limit),
    )(wkq_t, wvo, b_const, x)

    return out2d.reshape(bs, 1, D)


# -----------------------------------------------------------------------------
# Pure-JAX reference (unfolded, mirrors the PyTorch module exactly)
# -----------------------------------------------------------------------------
def _reference(x, params, *, heads):
    bs, S, D = x.shape
    d_head = params["wq"].shape[1] // heads
    u = jnp.broadcast_to(params["u"], (bs, 1, D))
    q = jnp.einsum("bqd,de->bqe", u, params["wq"]) + params["bq"]
    k = jnp.einsum("bsd,de->bse", x, params["wk"]) + params["bk"]
    v = jnp.einsum("bsd,de->bse", x, params["wv"]) + params["bv"]
    q = q.reshape(bs, 1, heads, d_head)
    k = k.reshape(bs, S, heads, d_head)
    v = v.reshape(bs, S, heads, d_head)
    scores = jnp.einsum("bqhd,bkhd->bhqk", q, k) / math.sqrt(d_head)
    attn = jax.nn.softmax(scores, axis=-1)
    o = jnp.einsum("bhqk,bkhd->bqhd", attn, v).reshape(bs, 1, heads * d_head)
    return jnp.einsum("bqe,ed->bqd", o, params["wo"]) + params["bo"]


def init_params(key, d_model, heads, use_reduced_head_dims=False):
    d_head = d_model // heads if use_reduced_head_dims else d_model
    proj = heads * d_head

    def xavier(k, fan_in, fan_out, shape):
        bound = math.sqrt(6.0 / (fan_in + fan_out))
        return jax.random.uniform(k, shape, jnp.float32, -bound, bound)

    ks = jax.random.split(key, 9)
    return {
        # learned query u (xavier_uniform on (d_model, 1), used as (1, d_model))
        "u":  xavier(ks[0], d_model, 1, (d_model, 1)).T,
        # Linear weights stored pre-transposed: (in_features, out_features)
        "wq": xavier(ks[1], d_model, proj, (d_model, proj)),
        "bq": jax.random.uniform(ks[2], (1, proj), jnp.float32, -0.01, 0.01),
        "wk": xavier(ks[3], d_model, proj, (d_model, proj)),
        "bk": jax.random.uniform(ks[4], (1, proj), jnp.float32, -0.01, 0.01),
        "wv": xavier(ks[5], d_model, proj, (d_model, proj)),
        "bv": jax.random.uniform(ks[6], (1, proj), jnp.float32, -0.01, 0.01),
        "wo": xavier(ks[7], proj, d_model, (proj, d_model)),
        "bo": jax.random.uniform(ks[8], (1, d_model), jnp.float32, -0.01, 0.01),
    }


if __name__ == "__main__":
    # Small, module-consistent shapes: batch=2, seq_len=8, d_model=32 (=2*num_units), heads=4.
    bs, seq_len, d_model, heads = 2, 8, 32, 4

    key = jax.random.PRNGKey(0)
    k_x, k_p = jax.random.split(key)
    x = jax.random.normal(k_x, (bs, seq_len, d_model), jnp.float32)  # biGRU_outputs
    params = init_params(k_p, d_model, heads, use_reduced_head_dims=False)

    # TODO(synk): dropout=None in eval mode -> no dropout; alternative attention
    # activations (sparsemax/entmax) not implemented, softmax only.
    ref = _reference(x, params, heads=heads)

    # Default fast path: bf16 x stream / folded weights, f32 softmax & accum.
    out = multihead_contextual_attention(x, params, heads=heads)
    out = jax.block_until_ready(out)
    assert out.shape == (bs, 1, d_model)
    assert jnp.allclose(out, ref, atol=5e-2, rtol=5e-2), \
        "bf16 path mismatch vs JAX reference"

    # Exact-parity path: f32 stream, exact softmax reciprocal.
    out_f32 = multihead_contextual_attention(
        x, params, heads=heads, compute_dtype=None, approx_reciprocal=False)
    out_f32 = jax.block_until_ready(out_f32)
    assert jnp.allclose(out_f32, ref, atol=5e-3, rtol=5e-3), \
        "f32 path mismatch vs JAX reference"

    print("KERNEL_OK")
</pallas_src>

<mosaic_0001>
module attributes {stable_mosaic.version = 11 : i64} {
  func.func @_mhca_kernel(%arg0: i32, %arg1: i32, %arg2: memref<32x4xbf16, #tpu.memory_space<vmem>>, %arg3: memref<4x32x32xbf16, #tpu.memory_space<vmem>>, %arg4: memref<1x32xf32, #tpu.memory_space<vmem>>, %arg5: memref<2x8x32xbf16, #tpu.memory_space<vmem>>, %arg6: memref<2x32xf32, #tpu.memory_space<vmem>>, %arg7: memref<2x4x1xf32, #tpu.memory_space<vmem>>, %arg8: memref<2x4x1xf32, #tpu.memory_space<vmem>>, %arg9: memref<2x4x32xf32, #tpu.memory_space<vmem>>) attributes {dimension_semantics = [#tpu.dimension_semantics<parallel>, #tpu.dimension_semantics<arbitrary>], iteration_bounds = array<i64: 1, 1>, scalar_prefetch = 0 : i64, scratch_operands = 3 : i64, tpu.core_type = #tpu.core_type<tc>, window_params = [{pipeline_mode = #tpu.pipeline_mode<synchronous>, transform_indices = @transform_0, window_bounds = array<i64: 32, 4>}, {pipeline_mode = #tpu.pipeline_mode<synchronous>, transform_indices = @transform_1, window_bounds = array<i64: 4, 32, 32>}, {pipeline_mode = #tpu.pipeline_mode<synchronous>, transform_indices = @transform_2, window_bounds = array<i64: 1, 32>}, {transform_indices = @transform_3, window_bounds = array<i64: 2, 8, 32>}, {transform_indices = @transform_4, window_bounds = array<i64: 2, 32>}]} {
    %c0_i32 = arith.constant 0 : i32
    %0 = arith.cmpi eq, %arg1, %c0_i32 : i32
    %1 = arith.extui %0 : i1 to i32
    %c0_i32_0 = arith.constant 0 : i32
    %2 = arith.cmpi ne, %1, %c0_i32_0 : i32
    scf.if %2 {
      %cst_28 = arith.constant 0xFF800000 : f32
      %35 = vector.broadcast %cst_28 : f32 to vector<2x4x1xf32>
      %c0_29 = arith.constant 0 : index
      %c0_30 = arith.constant 0 : index
      %c0_31 = arith.constant 0 : index
      %36 = vector.load %arg7[%c0_29, %c0_30, %c0_31] : memref<2x4x1xf32, #tpu.memory_space<vmem>>, vector<2x4x1xf32>
      tpu.vector_store %arg7[%c0_29, %c0_30, %c0_31], %35 {strides = array<i32>} : memref<2x4x1xf32, #tpu.memory_space<vmem>>, vector<2x4x1xf32>,
      %cst_32 = arith.constant 0.000000e+00 : f32
      %37 = vector.broadcast %cst_32 : f32 to vector<2x4x1xf32>
      %c0_33 = arith.constant 0 : index
      %c0_34 = arith.constant 0 : index
      %c0_35 = arith.constant 0 : index
      %38 = vector.load %arg8[%c0_33, %c0_34, %c0_35] : memref<2x4x1xf32, #tpu.memory_space<vmem>>, vector<2x4x1xf32>
      tpu.vector_store %arg8[%c0_33, %c0_34, %c0_35], %37 {strides = array<i32>} : memref<2x4x1xf32, #tpu.memory_space<vmem>>, vector<2x4x1xf32>,
      %cst_36 = arith.constant 0.000000e+00 : f32
      %39 = vector.broadcast %cst_36 : f32 to vector<2x4x32xf32>
      %c0_37 = arith.constant 0 : index
      %c0_38 = arith.constant 0 : index
      %c0_39 = arith.constant 0 : index
      %40 = vector.load %arg9[%c0_37, %c0_38, %c0_39] : memref<2x4x32xf32, #tpu.memory_space<vmem>>, vector<2x4x32xf32>
      tpu.vector_store %arg9[%c0_37, %c0_38, %c0_39], %39 {strides = array<i32>} : memref<2x4x32xf32, #tpu.memory_space<vmem>>, vector<2x4x32xf32>,
    } else {
    }
    %c0 = arith.constant 0 : index
    %c0_1 = arith.constant 0 : index
    %c0_2 = arith.constant 0 : index
    %3 = vector.load %arg5[%c0, %c0_1, %c0_2] : memref<2x8x32xbf16, #tpu.memory_space<vmem>>, vector<2x8x32xbf16>
    %4 = vector.shape_cast %3 : vector<2x8x32xbf16> to vector<16x32xbf16>
    %c0_3 = arith.constant 0 : index
    %c0_4 = arith.constant 0 : index
    %5 = vector.load %arg2[%c0_3, %c0_4] : memref<32x4xbf16, #tpu.memory_space<vmem>>, vector<32x4xbf16>
    %cst = arith.constant dense<0.000000e+00> : vector<16x4xf32>
    %6 = tpu.matmul %4, %5, %cst {dimension_numbers = #tpu.dot_dimension_numbers<[1], [0], [0], [1], [0, 0, 1, 1], [], []>} : vector<16x32xbf16>, vector<32x4xbf16>, vector<16x4xf32> -> vector<16x4xf32>
    %7 = vector.shape_cast %6 : vector<16x4xf32> to vector<2x8x4xf32>
    %8 = tpu.transpose %7, [0, 2, 1] : vector<2x8x4xf32> -> vector<2x4x8xf32>
    %c0_5 = arith.constant 0 : index
    %c0_6 = arith.constant 0 : index
    %c0_7 = arith.constant 0 : index
    %9 = vector.load %arg7[%c0_5, %c0_6, %c0_7] : memref<2x4x1xf32, #tpu.memory_space<vmem>>, vector<2x4x1xf32>
    %cst_8 = arith.constant dense<0xFF800000> : vector<2x4xf32>
    %10 = vector.multi_reduction <maximumf>, %8, %cst_8 [2] : vector<2x4x8xf32> to vector<2x4xf32>
    %11 = vector.shape_cast %10 : vector<2x4xf32> to vector<2x4x1xf32>
    %12 = arith.maximumf %9, %11 : vector<2x4x1xf32>
    %13 = arith.subf %9, %12 : vector<2x4x1xf32>
    %14 = math.exp %13 : vector<2x4x1xf32>
    %15 = vector.broadcast %12 : vector<2x4x1xf32> to vector<2x4x8xf32>
    %16 = arith.subf %8, %15 : vector<2x4x8xf32>
    %17 = math.exp %16 : vector<2x4x8xf32>
    %c0_9 = arith.constant 0 : index
    %c0_10 = arith.constant 0 : index
    %c0_11 = arith.constant 0 : index
    %18 = vector.load %arg8[%c0_9, %c0_10, %c0_11] : memref<2x4x1xf32, #tpu.memory_space<vmem>>, vector<2x4x1xf32>
    %19 = arith.mulf %14, %18 : vector<2x4x1xf32>
    %cst_12 = arith.constant dense<0.000000e+00> : vector<2x4xf32>
    %20 = vector.multi_reduction <add>, %17, %cst_12 [2] : vector<2x4x8xf32> to vector<2x4xf32>
    %21 = vector.shape_cast %20 : vector<2x4xf32> to vector<2x4x1xf32>
    %22 = arith.addf %19, %21 : vector<2x4x1xf32>
    %c0_13 = arith.constant 0 : index
    %c0_14 = arith.constant 0 : index
    %c0_15 = arith.constant 0 : index
    %23 = vector.load %arg8[%c0_13, %c0_14, %c0_15] : memref<2x4x1xf32, #tpu.memory_space<vmem>>, vector<2x4x1xf32>
    tpu.vector_store %arg8[%c0_13, %c0_14, %c0_15], %22 {strides = array<i32>} : memref<2x4x1xf32, #tpu.memory_space<vmem>>, vector<2x4x1xf32>,
    %c0_16 = arith.constant 0 : index
    %c0_17 = arith.constant 0 : index
    %c0_18 = arith.constant 0 : index
    %24 = vector.load %arg9[%c0_16, %c0_17, %c0_18] : memref<2x4x32xf32, #tpu.memory_space<vmem>>, vector<2x4x32xf32>
    %25 = vector.broadcast %14 : vector<2x4x1xf32> to vector<2x4x32xf32>
    %26 = arith.mulf %25, %24 : vector<2x4x32xf32>
    %27 = arith.truncf %17 : vector<2x4x8xf32> to vector<2x4x8xbf16>
    "tpu.trace_start"() <{level = 10 : i32, message = "bhs,bsd->bhd"}> : () -> ()
    %cst_19 = arith.constant dense<0.000000e+00> : vector<2x4x32xf32>
    %28 = tpu.matmul %27, %3, %cst_19 {dimension_numbers = #tpu.dot_dimension_numbers<[2], [1], [1], [2], [0, 0, 0, 1, 1, 2], [0], [0]>} : vector<2x4x8xbf16>, vector<2x8x32xbf16>, vector<2x4x32xf32> -> vector<2x4x32xf32>
    "tpu.trace_stop"() : () -> ()
    %29 = arith.addf %26, %28 : vector<2x4x32xf32>
    %c0_20 = arith.constant 0 : index
    %c0_21 = arith.constant 0 : index
    %c0_22 = arith.constant 0 : index
    %30 = vector.load %arg9[%c0_20, %c0_21, %c0_22] : memref<2x4x32xf32, #tpu.memory_space<vmem>>, vector<2x4x32xf32>
    tpu.vector_store %arg9[%c0_20, %c0_21, %c0_22], %29 {strides = array<i32>} : memref<2x4x32xf32, #tpu.memory_space<vmem>>, vector<2x4x32xf32>,
    %c0_23 = arith.constant 0 : index
    %c0_24 = arith.constant 0 : index
    %c0_25 = arith.constant 0 : index
    %31 = vector.load %arg7[%c0_23, %c0_24, %c0_25] : memref<2x4x1xf32, #tpu.memory_space<vmem>>, vector<2x4x1xf32>
    tpu.vector_store %arg7[%c0_23, %c0_24, %c0_25], %12 {strides = array<i32>} : memref<2x4x1xf32, #tpu.memory_space<vmem>>, vector<2x4x1xf32>,
    %c0_i32_26 = arith.constant 0 : i32
    %32 = arith.cmpi eq, %arg1, %c0_i32_26 : i32
    %33 = arith.extui %32 : i1 to i32
    %c0_i32_27 = arith.constant 0 : i32
    %34 = arith.cmpi ne, %33, %c0_i32_27 : i32
    scf.if %34 {
      %c0_28 = arith.constant 0 : index
      %c0_29 = arith.constant 0 : index
      %c0_30 = arith.constant 0 : index
      %35 = vector.load %arg9[%c0_28, %c0_29, %c0_30] : memref<2x4x32xf32, #tpu.memory_space<vmem>>, vector<2x4x32xf32>
      %c0_31 = arith.constant 0 : index
      %c0_32 = arith.constant 0 : index
      %c0_33 = arith.constant 0 : index
      %36 = vector.load %arg8[%c0_31, %c0_32, %c0_33] : memref<2x4x1xf32, #tpu.memory_space<vmem>>, vector<2x4x1xf32>
      %37 = tpu.reciprocal %36 {approx = true} : vector<2x4x1xf32> -> vector<2x4x1xf32>
      %38 = vector.broadcast %37 : vector<2x4x1xf32> to vector<2x4x32xf32>
      %39 = arith.mulf %35, %38 : vector<2x4x32xf32>
      %c0_34 = arith.constant 0 : index
      %c0_35 = arith.constant 0 : index
      %40 = vector.load %arg4[%c0_34, %c0_35] : memref<1x32xf32, #tpu.memory_space<vmem>>, vector<1x32xf32>
      %41 = vector.extract_strided_slice %39 {offsets = [0, 0, 0], sizes = [2, 1, 32], strides = [1, 1, 1]} : vector<2x4x32xf32> to vector<2x1x32xf32>
      %42 = vector.shape_cast %41 : vector<2x1x32xf32> to vector<2x32xf32>
      %43 = arith.truncf %42 : vector<2x32xf32> to vector<2x32xbf16>
      %c0_36 = arith.constant 0 : index
      %c0_37 = arith.constant 0 : index
      %c0_38 = arith.constant 0 : index
      %44 = vector.load %arg3[%c0_36, %c0_37, %c0_38] : memref<4x32x32xbf16, #tpu.memory_space<vmem>>, vector<1x32x32xbf16>
      %45 = vector.shape_cast %44 : vector<1x32x32xbf16> to vector<32x32xbf16>
      %cst_39 = arith.constant dense<0.000000e+00> : vector<2x32xf32>
      %46 = tpu.matmul %43, %45, %cst_39 {dimension_numbers = #tpu.dot_dimension_numbers<[1], [0], [0], [1], [0, 0, 1, 1], [], []>} : vector<2x32xbf16>, vector<32x32xbf16>, vector<2x32xf32> -> vector<2x32xf32>
      %47 = vector.broadcast %40 : vector<1x32xf32> to vector<2x32xf32>
      %48 = arith.addf %47, %46 : vector<2x32xf32>
      %49 = vector.extract_strided_slice %39 {offsets = [0, 1, 0], sizes = [2, 1, 32], strides = [1, 1, 1]} : vector<2x4x32xf32> to vector<2x1x32xf32>
      %50 = vector.shape_cast %49 : vector<2x1x32xf32> to vector<2x32xf32>
      %51 = arith.truncf %50 : vector<2x32xf32> to vector<2x32xbf16>
      %c1 = arith.constant 1 : index
      %c0_40 = arith.constant 0 : index
      %c0_41 = arith.constant 0 : index
      %52 = vector.load %arg3[%c1, %c0_40, %c0_41] : memref<4x32x32xbf16, #tpu.memory_space<vmem>>, vector<1x32x32xbf16>
      %53 = vector.shape_cast %52 : vector<1x32x32xbf16> to vector<32x32xbf16>
      %cst_42 = arith.constant dense<0.000000e+00> : vector<2x32xf32>
      %54 = tpu.matmul %51, %53, %cst_42 {dimension_numbers = #tpu.dot_dimension_numbers<[1], [0], [0], [1], [0, 0, 1, 1], [], []>} : vector<2x32xbf16>, vector<32x32xbf16>, vector<2x32xf32> -> vector<2x32xf32>
      %55 = arith.addf %48, %54 : vector<2x32xf32>
      %56 = vector.extract_strided_slice %39 {offsets = [0, 2, 0], sizes = [2, 1, 32], strides = [1, 1, 1]} : vector<2x4x32xf32> to vector<2x1x32xf32>
      %57 = vector.shape_cast %56 : vector<2x1x32xf32> to vector<2x32xf32>
      %58 = arith.truncf %57 : vector<2x32xf32> to vector<2x32xbf16>
      %c2 = arith.constant 2 : index
      %c0_43 = arith.constant 0 : index
      %c0_44 = arith.constant 0 : index
      %59 = vector.load %arg3[%c2, %c0_43, %c0_44] : memref<4x32x32xbf16, #tpu.memory_space<vmem>>, vector<1x32x32xbf16>
      %60 = vector.shape_cast %59 : vector<1x32x32xbf16> to vector<32x32xbf16>
      %cst_45 = arith.constant dense<0.000000e+00> : vector<2x32xf32>
      %61 = tpu.matmul %58, %60, %cst_45 {dimension_numbers = #tpu.dot_dimension_numbers<[1], [0], [0], [1], [0, 0, 1, 1], [], []>} : vector<2x32xbf16>, vector<32x32xbf16>, vector<2x32xf32> -> vector<2x32xf32>
      %62 = arith.addf %55, %61 : vector<2x32xf32>
      %63 = vector.extract_strided_slice %39 {offsets = [0, 3, 0], sizes = [2, 1, 32], strides = [1, 1, 1]} : vector<2x4x32xf32> to vector<2x1x32xf32>
      %64 = vector.shape_cast %63 : vector<2x1x32xf32> to vector<2x32xf32>
      %65 = arith.truncf %64 : vector<2x32xf32> to vector<2x32xbf16>
      %c3 = arith.constant 3 : index
      %c0_46 = arith.constant 0 : index
      %c0_47 = arith.constant 0 : index
      %66 = vector.load %arg3[%c3, %c0_46, %c0_47] : memref<4x32x32xbf16, #tpu.memory_space<vmem>>, vector<1x32x32xbf16>
      %67 = vector.shape_cast %66 : vector<1x32x32xbf16> to vector<32x32xbf16>
      %cst_48 = arith.constant dense<0.000000e+00> : vector<2x32xf32>
      %68 = tpu.matmul %65, %67, %cst_48 {dimension_numbers = #tpu.dot_dimension_numbers<[1], [0], [0], [1], [0, 0, 1, 1], [], []>} : vector<2x32xbf16>, vector<32x32xbf16>, vector<2x32xf32> -> vector<2x32xf32>
      %69 = arith.addf %62, %68 : vector<2x32xf32>
      %c0_49 = arith.constant 0 : index
      %c0_50 = arith.constant 0 : index
      %70 = vector.load %arg6[%c0_49, %c0_50] : memref<2x32xf32, #tpu.memory_space<vmem>>, vector<2x32xf32>
      tpu.vector_store %arg6[%c0_49, %c0_50], %69 {strides = array<i32>} : memref<2x32xf32, #tpu.memory_space<vmem>>, vector<2x32xf32>,
    } else {
    }
    return
  }
  func.func @transform_0(%arg0: i32, %arg1: i32) -> (i32, i32) {
    %c0_i32 = arith.constant 0 : i32
    %c0_i32_0 = arith.constant 0 : i32
    %c0_i32_1 = arith.constant 0 : i32
    return %c0_i32, %c0_i32_0 : i32, i32
  }
  func.func @transform_1(%arg0: i32, %arg1: i32) -> (i32, i32, i32) {
    %c0_i32 = arith.constant 0 : i32
    %c0_i32_0 = arith.constant 0 : i32
    %c0_i32_1 = arith.constant 0 : i32
    %c0_i32_2 = arith.constant 0 : i32
    return %c0_i32, %c0_i32_0, %c0_i32_1 : i32, i32, i32
  }
  func.func @transform_2(%arg0: i32, %arg1: i32) -> (i32, i32) {
    %c0_i32 = arith.constant 0 : i32
    %c0_i32_0 = arith.constant 0 : i32
    %c0_i32_1 = arith.constant 0 : i32
    return %c0_i32, %c0_i32_0 : i32, i32
  }
  func.func @transform_3(%arg0: i32, %arg1: i32) -> (i32, i32, i32) {
    %c0_i32 = arith.constant 0 : i32
    %c0_i32_0 = arith.constant 0 : i32
    return %arg0, %arg1, %c0_i32 : i32, i32, i32
  }
  func.func @transform_4(%arg0: i32, %arg1: i32) -> (i32, i32) {
    %c0_i32 = arith.constant 0 : i32
    %c0_i32_0 = arith.constant 0 : i32
    return %arg0, %c0_i32 : i32, i32
  }
}

</mosaic_0001>

<bundles_post_ra>
// kernel: tpu_custom_call.1
= control target key start
LH: loop header
LB: loop body
LE: loop exit
PB: predicated region body
PF: predicated region fallthrough
CT: control target
= control target key end

     0   :  { %9 = vsyncpa [#allocation6], 0  ;;  %s929_s0 = inlined_call_operand.vmem [shape: bf16[32,4], index: 0, kind: input, shape index: {}]   ;;  %s930_s1 = inlined_call_operand.hbm [shape: bf16[4,32,32], index: 1, kind: input, shape index: {}]   ;;  %s931_s2 = inlined_call_operand.vmem [shape: f32[1,32], index: 2, kind: input, shape index: {}]   ;;  %s932_s3 = inlined_call_operand.vmem [shape: bf16[2,8,32], index: 3, kind: input, shape index: {}]   ;;  %s933_s4 = inlined_call_operand.hbm [shape: f32[2,32], index: 4, kind: output, shape index: {}]  }
   0x1   :  { %10 = vsyncpa [#allocation7], 0  ;;  %s818_s15 = smov [#allocation5]  }
   0x2   :  { %s18_s16 = sshll.u32 %s818_s15, 4  ;;  %s19_s16 = int_to_ptr.vmem [resolvable:$true] %s18_s16 }
   0x3   :  { %s782_s17 = scalar_lea.vmem %s19_s16, 1024  ;;  %p787_p1 = scmp.lt.s32.totalorder %s19_s16, %s19_s16 }
   0x4   :  { %p783_p0 = scmp.ne.s32.totalorder %s19_s16, %s782_s17  ;;  %p788_p2 = scmp.lt.s32.totalorder %s782_s17, %s782_s17 }
   0x6   :  { %p789_p3 = por %p788_p2, %p787_p1 }
   0x8   :  { %p790_p4 = pnand %p789_p3, %p783_p0 }
   0xa   :  { %793 = shalt.err (!%p790_p4)
}
   0xb   :  { %s819_s18 = smov 64   ;;  %s820_s19 = smov 4  }
   0xc   :  { %24 = dma.hbm_to_vmem [thread:$0]  %s930_s1, 1024, %s19_s16, [#allocation6], %s819_s18, %s819_s18, %s820_s19  }
   0xd   :  { %814 = dma.done.wait [#allocation6], 1024  }
   0xe   :  { %815 = vsyncadd [#allocation6], 4294966272  ;;  %v821_v0 = vmov 0.0   ;;  %vm822_vm0 = vmmov 0   ;;  %v751_v1 = vld [vmem:[%s929_s0 + $0x8] sm:$0xff]   ;;  %v752_v2 = vld [vmem:[%s929_s0] sm:$0xff]  }
   0xf   :  { %689 = vmatprep.subr.bf16.mxu0 %v821_v0  ;;  %693 = vmatprep.mubr.msk.bf16.mxu0 %vm822_vm0, %v821_v0  ;;  %vm68_vm1 = vcmask 261120   ;;  %v45_v3 = vld [vmem:[%s932_s3] sm:$0xf]  ;;  %v46_v4 = vld [vmem:[%s932_s3 + $0x4] sm:$0xf]  ;;  %vm37_vm2 = vcmask 3072  }
  0x10   :  { %697 = vmatprep.subr.bf16.mxu1 %v821_v0  ;;  %699 = vmatprep.mubr.msk.bf16.mxu1 %vm822_vm0, %v821_v0  ;;  %v651_v5 = vcombine.low %v45_v3, %v46_v4  ;;  %v823_v9 = vmov -inf   ;;  %40 = vst.msk [vmem:[#allocation3] sm:$0xf] %vm37_vm2, %v821_v0  ;;  %41 = vst.msk [vmem:[#allocation3 + $0x4] sm:$0xf] %vm37_vm2, %v821_v0  ;;  %vm179_vm3 = vcmask 60416  }
  0x11   :  { %690 = vmatpush3.bf16.msra.mxu0 %v751_v1  ;;  %38 = vst.msk [vmem:[#allocation2] sm:$0xf] %vm37_vm2, %v823_v9  ;;  %39 = vst.msk [vmem:[#allocation2 + $0x4] sm:$0xf] %vm37_vm2, %v823_v9  ;;  %v824_v15 = vmov 0   ;;  %vm245_vm4 = vcmask 1043456  }
  0x12   :  { %691 = vmatprep.subr.bf16.mxu0 %v821_v0  ;;  %750 = vset.pattern.permute.xlu1 %v824_v15  ;;  %v247_v24 = vsel %vm245_vm4, %v45_v3, 0  ;;  %vm241_vm5 = vcmask 64512   ;;  %v293_v33 = vsel %vm245_vm4, %v46_v4, 0  ;;  %vm42_vm6 = vcmask 257024   ;;  %v754_v53 = vld [vmem:[#allocation5 + $0x18] sm:$0xff]   ;;  %v755_v54 = vld [vmem:[#allocation5 + $0x8] sm:$0xff]  }
  0x13   :  { %698 = vmatpush3.bf16.msra.mxu1 %v247_v24  ;;  %43 = vst.msk [vmem:[#allocation4] sm:$0xf] %vm42_vm6, %v821_v0  ;;  %44 = vst.msk [vmem:[#allocation4 + $0x4] sm:$0xf] %vm42_vm6, %v821_v0  ;;  %v756_v56 = vld [vmem:[#allocation5 + $0x10] sm:$0xff]   ;;  %v757_v57 = vld [vmem:[#allocation5] sm:$0xff]  }
  0x14   :  { %703 = vmatprep.subr.bf16.mxu1 %v821_v0  ;;  %vm375_vm7 = vcmask 1041409   ;;  %v758_v24 = vld [vmem:[#allocation5 + $0x38] sm:$0xff]   ;;  %s825_s29 = smov [#allocation8]   ;;  %vm634_vm8 = vcmask 254976  }
  0x15   :  { %692 = vmatpush3.bf16.msra.mxu0 %v752_v2  ;;  %s642_s30 = sshll.u32 %s825_s29, 4  ;;  %s643_s30 = int_to_ptr.vmem [resolvable:$true] %s642_s30 }
  0x16   :  { %709 = vmatprep.subr.bf16.mxu0 %v821_v0  ;;  %p799_p6 = scmp.lt.s32.totalorder %s643_s30, %s643_s30 }
  0x17   :  { %v210_v42 = vld [vmem:[#allocation3] sm:$0xf]  ;;  %v211_v45 = vld [vmem:[#allocation3 + $0x4] sm:$0xf] }
  0x18   :  { %694 = vmatmul.mubr.msk.bf16.vlgmr.msra.gmra.mxu0 %vm68_vm1, %v651_v5  ;;  %v177_v16 = vld [vmem:[#allocation2] sm:$0xf]  ;;  %v178_v19 = vld [vmem:[#allocation2 + $0x4] sm:$0xf] }
  0x19   :  { %713 = vmatprep.mubr.msk.bf16.mxu0 %vm822_vm0, %v821_v0  ;;  %710 = vmatpush3.bf16.msra.mxu0 %v755_v54 }
  0x1a   :  { %711 = vmatprep.subr.bf16.mxu0 %v821_v0  ;;  %v225_v58 = vld [vmem:[#allocation4] sm:$0xf]  ;;  %v226_v1 = vld [vmem:[#allocation4 + $0x4] sm:$0xf] }
  0x1d   :  { %712 = vmatpush3.bf16.msra.mxu0 %v757_v57 }
  0x1e   :  { %725 = vmatprep.subr.bf16.mxu0 %v821_v0 }
  0xd8   :  { %v106_v6 = vpop.f32.mrf.mxu0 }
  0xd9   :  { %113 = vxpose.xlu0.b32.start.end [1/1] (short) (narrow) %v106_v6, 8 }
  0xda   :  { %v695_v7 = vpop.f32.mrf.mxu0 }
  0xdc   :  { %v109_v8 = vpop.f32.mrf.mxu0 }
  0xdd   :  { %145 = vxpose.xlu0.b32.start.end [1/1] (short) (narrow) %v109_v8, 8 }
  0xde   :  { %v696_v10 = vpop.f32.mrf.mxu0 }
 0x106   :  { %749 = vset.pattern.permute.xlu0 %v824_v15 }
 0x155   :  { %v129_v11 = vpop.trf.xlu0 }
 0x156   :  { %v180_v12 = vsel %vm179_vm3, %v129_v11, -inf }
 0x157   :  { %181 = vmax.xlane.f32.xlu1 %v180_v12 }
 0x159   :  { %v161_v13 = vpop.trf.xlu0 }
 0x15a   :  { %v183_v14 = vsel %vm179_vm3, %v161_v13, -inf }
 0x15b   :  { %184 = vmax.xlane.f32.xlu1 %v183_v14 }
 0x1e0   :  { %v182_v17 = vpop.xlane.xlu1 %181 }
 0x1e1   :  { %v186_v18 = vmax.f32 %v177_v16, %v182_v17 }
 0x1e3   :  { %v188_v20 = vsub.f32 %v177_v16, %v186_v18  ;;  %340 = vst.msk [vmem:[#allocation2] sm:$0xf] %vm37_vm2, %v186_v18  ;;  %196 = vperm.xlu0 %749, %v186_v18  }
 0x1e4   :  { %v185_v21 = vpop.xlane.xlu1 %184 }
 0x1e5   :  { %v187_v22 = vmax.f32 %v178_v19, %v185_v21  ;;  %v190_v32 = vmul.f32 1.442695, %v188_v20 }
 0x1e7   :  { %v189_v23 = vsub.f32 %v178_v19, %v187_v22  ;;  %341 = vst.msk [vmem:[#allocation2 + $0x4] sm:$0xf] %vm37_vm2, %v187_v22  ;;  %201 = vperm.xlu1 %750, %v187_v22  }
 0x1e9   :  { %v192_v37 = vmul.f32 1.442695, %v189_v23 }
 0x25e   :  { %v197_v25 = vpop.permute.xlu0 %196 }
 0x25f   :  { %v204_v26 = vsub.f32 %v129_v11, %v197_v25 }
 0x261   :  { %v206_v27 = vmul.f32 1.442695, %v204_v26 }
 0x262   :  { %v202_v28 = vpop.permute.xlu1 %201 }
 0x263   :  { %762 = vpow2.f32 %v206_v27  ;;  %v205_v29 = vsub.f32 %v161_v13, %v202_v28  ;;  %v759_v28 = vld [vmem:[#allocation5 + $0x28] sm:$0xff]  }
 0x265   :  { %v208_v30 = vmul.f32 1.442695, %v205_v29 }
 0x267   :  { %764 = vpow2.f32 %v208_v30 }
 0x268   :  { %766 = vpow2.f32 %v190_v32  ;;  %v760_v32 = vld [vmem:[#allocation5 + $0x30] sm:$0xff]  }
 0x269   :  { %768 = vpow2.f32 %v192_v37 }
 0x270   :  { %v763_v31 = vpop.eup %762 }
 0x271   :  { %v214_v34 = vsel %vm179_vm3, %v763_v31, 0.0  ;;  %v239_v35 = vpack.c.bf16 %v763_v31, %v763_v31 }
 0x272   :  { %215 = vadd.xlane.f32.xlu1 %v214_v34  ;;  %v761_v34 = vld [vmem:[#allocation5 + $0x20] sm:$0xff]  }
 0x273   :  { %700 = vmatmul.mubr.msk.bf16.vlgmr.msra.gmra.mxu1 %vm241_vm5, %v239_v35 }
 0x274   :  { %v765_v36 = vpop.eup %764  ;;  %704 = vmatpush3.bf16.msra.mxu1 %v293_v33  ;;  %705 = vmatprep.mubr.msk.bf16.mxu1 %vm822_vm0, %v821_v0 }
 0x275   :  { %v217_v38 = vsel %vm179_vm3, %v765_v36, 0.0  ;;  %717 = vmatprep.subr.bf16.mxu1 %v821_v0  ;;  %v240_v39 = vpack.c.bf16 %v765_v36, %v765_v36  ;;  %v767_v40 = vpop.eup %766 }
 0x276   :  { %218 = vadd.xlane.f32.xlu0 %v217_v38  ;;  %v769_v41 = vpop.eup %768  ;;  %v212_v43 = vmul.f32 %v767_v40, %v210_v42 }
 0x277   :  { %v213_v47 = vmul.f32 %v769_v41, %v211_v45 }
 0x27b   :  { %706 = vmatmul.mubr.msk.bf16.vlgmr.msra.gmra.mxu1 %vm241_vm5, %v240_v39 }
 0x27c   :  { %721 = vmatprep.mubr.msk.bf16.mxu1 %vm822_vm0, %v821_v0  ;;  %718 = vmatpush3.bf16.msra.mxu1 %v754_v53 }
 0x27d   :  { %719 = vmatprep.subr.bf16.mxu1 %v821_v0 }
 0x280   :  { %720 = vmatpush3.bf16.msra.mxu1 %v756_v56 }
 0x281   :  { %733 = vmatprep.subr.bf16.mxu1 %v821_v0 }
 0x283   :  { %229 = vperm.xlu1 %750, %v767_v40   ;;  %v660_v40 = vld [vmem:[%s931_s2] ss:$0 sm:$0xff]  ;;  %s794_s2 = scalar_lea.vmem %s643_s30, 32 }
 0x284   :  { %p795_p5 = scmp.ne.s32.totalorder %s643_s30, %s794_s2  ;;  %p800_p7 = scmp.lt.s32.totalorder %s794_s2, %s794_s2 }
 0x286   :  { %p801_p8 = por %p800_p7, %p799_p6 }
 0x287   :  { %234 = vperm.xlu1 %750, %v769_v41  }
 0x288   :  { %p802_p9 = pnand %p801_p8, %p795_p5 }
 0x2fb   :  { %v216_v44 = vpop.xlane.xlu1 %215 }
 0x2fc   :  { %v220_v46 = vadd.f32 %v216_v44, %v212_v43 }
 0x2fe   :  { %223 = vst.msk [vmem:[#allocation3] sm:$0xf] %vm37_vm2, %v220_v46 }
 0x2ff   :  { %v219_v48 = vpop.xlane.xlu0 %218  ;;  %v230_v59 = vpop.permute.xlu1 %229 }
 0x300   :  { %v221_v49 = vadd.f32 %v219_v48, %v213_v47  ;;  %v237_v60 = vmul.f32 %v230_v59, %v225_v58 }
 0x302   :  { %224 = vst.msk [vmem:[#allocation3 + $0x4] sm:$0xf] %vm37_vm2, %v221_v49 }
 0x303   :  { %v235_v2 = vpop.permute.xlu1 %234 }
 0x304   :  { %v238_v5 = vmul.f32 %v235_v2, %v226_v1 }
 0x305   :  { %v347_v50 = vld [vmem:[#allocation3] sm:$0xf] }
 0x306   :  { %770 = vrcp.f32 %v347_v50 }
 0x309   :  { %v348_v51 = vld [vmem:[#allocation3 + $0x4] sm:$0xf] }
 0x30a   :  { %772 = vrcp.f32 %v348_v51 }
 0x313   :  { %v771_v52 = vpop.eup %770 }
 0x314   :  { %353 = vperm.xlu0 %749, %v771_v52  }
 0x317   :  { %v773_v55 = vpop.eup %772 }
 0x318   :  { %358 = vperm.xlu1 %750, %v773_v55  }
 0x333   :  { %v283_v61 = vpop.f32.mrf.mxu1 }
 0x334   :  { %v335_v62 = vadd.f32 %v283_v61, %v237_v60 }
 0x335   :  { %v701_v63 = vpop.f32.mrf.mxu1 }
 0x336   :  { %338 = vst.msk [vmem:[#allocation4] sm:$0xf] %vm42_vm6, %v335_v62 }
 0x337   :  { %v286_v3 = vpop.f32.mrf.mxu1 }
 0x339   :  { %v702_v4 = vpop.f32.mrf.mxu1 }
 0x33b   :  { %v329_v6 = vpop.f32.mrf.mxu1 }
 0x33c   :  { %v336_v7 = vadd.f32 %v329_v6, %v238_v5 }
 0x33d   :  { %v707_v8 = vpop.f32.mrf.mxu1  ;;  %v345_v11 = vld [vmem:[#allocation4] sm:$0xf] }
 0x33e   :  { %339 = vst.msk [vmem:[#allocation4 + $0x4] sm:$0xf] %vm42_vm6, %v336_v7 }
 0x33f   :  { %v332_v9 = vpop.f32.mrf.mxu1 }
 0x341   :  { %v708_v10 = vpop.f32.mrf.mxu1 }
 0x345   :  { %v346_v15 = vld [vmem:[#allocation4 + $0x4] sm:$0xf] }
 0x38f   :  { %v354_v12 = vpop.permute.xlu0 %353 }
 0x390   :  { %v361_v13 = vmul.f32 %v354_v12, %v345_v11 }
 0x392   :  { %v364_v14 = vpack.c.bf16 %v361_v13, %v361_v13 }
 0x393   :  { %v359_v16 = vpop.permute.xlu1 %358 }
 0x394   :  { %v372_v17 = vunpack.c.l.b16 %v364_v14  ;;  %v362_v18 = vmul.f32 %v359_v16, %v346_v15 }
 0x396   :  { %v365_v19 = vpack.c.bf16 %v362_v18, %v362_v18  ;;  %v445_v20 = vrot.slane %v372_v17, 1  ;;  %v574_v30 = vrot.slane %v372_v17, 3  ;;  %v509_v33 = vrot.slane %v372_v17, 2 }
 0x398   :  { %v373_v21 = vunpack.c.l.b16 %v365_v19 }
 0x39a   :  { %v374_v22 = vrot.slane %v373_v21, 7  ;;  %v446_v23 = vsel %vm375_vm7, %v373_v21, %v445_v20  ;;  %v575_v26 = vrot.slane %v373_v21, 2  ;;  %v510_v31 = vrot.slane %v373_v21, 1 }
 0x39b   :  { %v447_v25 = vpack.c.b16 %v446_v23, %v446_v23 }
 0x39c   :  { %v376_v27 = vsel %vm375_vm7, %v374_v22, %v372_v17  ;;  %v576_v35 = vsel %vm375_vm7, %v575_v26, %v574_v30  ;;  %v511_v36 = vsel %vm375_vm7, %v510_v31, %v509_v33 }
 0x39d   :  { %722 = vmatmul.mubr.msk.bf16.vlgmr.msra.gmra.mxu1 %vm68_vm1, %v447_v25  ;;  %v377_v29 = vpack.c.b16 %v376_v27, %v376_v27  ;;  %v577_v37 = vpack.c.b16 %v576_v35, %v576_v35  ;;  %v512_v38 = vpack.c.b16 %v511_v36, %v511_v36 }
 0x39e   :  { %734 = vmatpush3.bf16.msra.mxu1 %v758_v24  ;;  %737 = vmatprep.mubr.msk.bf16.mxu1 %vm822_vm0, %v821_v0 }
 0x39f   :  { %714 = vmatmul.mubr.msk.bf16.vlgmr.msra.gmra.mxu0 %vm68_vm1, %v377_v29  ;;  %735 = vmatprep.subr.bf16.mxu1 %v821_v0 }
 0x3a0   :  { %726 = vmatpush3.bf16.msra.mxu0 %v759_v28  ;;  %729 = vmatprep.mubr.msk.bf16.mxu0 %vm822_vm0, %v821_v0 }
 0x3a1   :  { %727 = vmatprep.subr.bf16.mxu0 %v821_v0 }
 0x3a2   :  { %736 = vmatpush3.bf16.msra.mxu1 %v760_v32 }
 0x3a4   :  { %728 = vmatpush3.bf16.msra.mxu0 %v761_v34 }
 0x3a5   :  { %738 = vmatmul.mubr.msk.bf16.vlgmr.msra.gmra.mxu1 %vm68_vm1, %v577_v37 }
 0x3a7   :  { %730 = vmatmul.mubr.msk.bf16.vlgmr.msra.gmra.mxu0 %vm68_vm1, %v512_v38 }
 0x45d   :  { %v497_v39 = vpop.f32.mrf.mxu1 }
 0x45f   :  { %v427_v41 = vpop.f32.mrf.mxu0  ;;  %v723_v42 = vpop.f32.mrf.mxu1 }
 0x460   :  { %v439_v0 = vadd.f32 %v660_v40, %v427_v41 }
 0x461   :  { %v715_v43 = vpop.f32.mrf.mxu0  ;;  %v500_v44 = vpop.f32.mrf.mxu1 }
 0x462   :  { %v503_v49 = vadd.f32 %v497_v39, %v439_v0 }
 0x463   :  { %v430_v45 = vpop.f32.mrf.mxu0  ;;  %v724_v46 = vpop.f32.mrf.mxu1 }
 0x465   :  { %v716_v47 = vpop.f32.mrf.mxu0  ;;  %v627_v48 = vpop.f32.mrf.mxu1 }
 0x467   :  { %v562_v50 = vpop.f32.mrf.mxu0  ;;  %v739_v51 = vpop.f32.mrf.mxu1 }
 0x468   :  { %v568_v52 = vadd.f32 %v562_v50, %v503_v49 }
 0x469   :  { %v731_v53 = vpop.f32.mrf.mxu0  ;;  %v630_v54 = vpop.f32.mrf.mxu1 }
 0x46a   :  { %v633_v55 = vadd.f32 %v627_v48, %v568_v52 }
 0x46b   :  { %v565_v56 = vpop.f32.mrf.mxu0  ;;  %v740_v57 = vpop.f32.mrf.mxu1 }
 0x46c   :  { %635 = vst.msk [vmem:[#allocation8] sm:$0x3] %vm634_vm8, %v633_v55 }
 0x46d   :  { %v732_v58 = vpop.f32.mrf.mxu0 }
 0x46e   :  { %805 = shalt.err (!%p802_p9)
}
 0x46f   :  { %645 = dma.vmem_to_hbm [thread:$0]  %s643_s30, 32, %s933_s4, [#allocation7]  }
 0x470   :  { %816 = dma.done.wait [#allocation7], 32  }
 0x471   :  { %817 = vsyncadd [#allocation7], 4294967264 }
 0x472   :  { %649 = vsyncpa [#allocation6], 1 }
 0x473   :  { %650 = vsyncpa [#allocation7], 1 }

</bundles_post_ra>
